<compile_context>
chip_gen: v5e
topology: v5e:2x2
jax: 0.10.0
libtpu: 0.0.40
codegen_flags: <defaults>
</compile_context>

<pallas_src>
import functools

import jax
import jax.numpy as jnp
from jax.experimental import pallas as pl
from jax.experimental.pallas import tpu as pltpu

LANE = 128


def _round_up(x, m):
    return ((x + m - 1) // m) * m


def _sublane_pack(dtype):
    # Rows per packed vreg tile: 8 for 4-byte dtypes, 16 for bf16, 32 for int8/fp8.
    return 8 * (4 // jnp.dtype(dtype).itemsize)


def _vmem_capacity_bytes():
    # Per-core VMEM capacity; conservative fallback = v7x's 64 MiB per TC.
    try:
        info = pltpu.get_tpu_info()
        cap = getattr(info, "vmem_capacity_bytes", None)
        if cap:
            return int(cap)
    except Exception:
        pass
    return 64 << 20


# ---------------------------------------------------------------------------
# Fused MLP kernel: x -> [linear + ReLU] * n_hidden -> linear
# refs layout: (x, w0, b0, w1, b1, ..., w_{n-1}, b_{n-1}, out)
# ---------------------------------------------------------------------------
def _fused_mlp_kernel(*refs, n_layers, matmul_dtype):
    x_ref = refs[0]
    o_ref = refs[-1]

    h = x_ref[...].astype(matmul_dtype)          # per-tile activation cast only
    for layer in range(n_layers):
        w_ref = refs[1 + 2 * layer]              # already stored in matmul_dtype
        b_ref = refs[2 + 2 * layer]              # f32 bias
        y = jnp.dot(h, w_ref[...], preferred_element_type=jnp.float32)
        y = y + b_ref[...]                       # f32 epilogue (v5e-safe)
        if layer < n_layers - 1:
            y = jnp.maximum(y, 0.0)              # hidden_activation = ReLU
            h = y.astype(matmul_dtype)           # feed next MXU pass
        else:
            h = y
    o_ref[...] = h.astype(o_ref.dtype)


# ---------------------------------------------------------------------------
# Parameter init (mirrors the PyTorch module's __init__)
# ---------------------------------------------------------------------------
def init_params(key, input_size, hidden_sizes, output_size,
                init_w=0.003, b_init_value=0.0):
    """nn.Linear weights are (out, in); fanin_init uses size[0] (= out) as
    fan_in for 2-D weights (quirk of the original code, reproduced here)."""
    params = []
    in_size = input_size
    for next_size in hidden_sizes:
        key, wk = jax.random.split(key)
        bound = 1.0 / jnp.sqrt(jnp.float32(next_size))   # fan_in = size[0] = out
        w = jax.random.uniform(wk, (next_size, in_size), jnp.float32,
                               minval=-bound, maxval=bound)
        b = jnp.full((next_size,), b_init_value, jnp.float32)
        params.append((w, b))
        in_size = next_size
    key, wk = jax.random.split(key)
    w_last = jax.random.uniform(wk, (output_size, in_size), jnp.float32,
                                minval=-init_w, maxval=init_w)
    b_last = jnp.zeros((output_size,), jnp.float32)
    params.append((w_last, b_last))
    return params


def pack_params(params, input_size, output_sizes, matmul_dtype=jnp.bfloat16):
    """Pre-transpose (out,in)->(in,out), zero-pad every feature dim to a
    multiple of 128 and store weights directly in matmul_dtype (bf16 default)
    ONCE, so the forward pass does no layout or cast work on weights."""
    dims = [input_size] + [w.shape[0] for (w, _) in params]
    pdims = [_round_up(d, LANE) for d in dims]
    layers = []
    for i, (w, b) in enumerate(params):
        w_t = w.T.astype(matmul_dtype)                       # (in, out), once
        w_p = jnp.zeros((pdims[i], pdims[i + 1]), matmul_dtype)
        w_p = w_p.at[:dims[i], :dims[i + 1]].set(w_t)
        b_p = jnp.zeros((1, pdims[i + 1]), jnp.float32)      # bias stays f32
        b_p = b_p.at[0, :dims[i + 1]].set(b)
        layers.append((w_p, b_p))
    return dict(layers=layers, dims=dims, padded_dims=pdims,
                output_sizes=tuple(output_sizes), matmul_dtype=matmul_dtype)


# ---------------------------------------------------------------------------
# pallas_call construction
# ---------------------------------------------------------------------------
def _mlp_pallas_call(packed, x_padded, batch, tb, vmem_limit, single_buffer_weights):
    layers = packed["layers"]
    pdims = packed["padded_dims"]
    in_pad, out_pad = pdims[0], pdims[-1]
    n_layers = len(layers)

    kernel = functools.partial(_fused_mlp_kernel,
                               n_layers=n_layers,
                               matmul_dtype=packed["matmul_dtype"])

    in_specs = [pl.BlockSpec((tb, in_pad), lambda i: (i, 0))]
    flat_inputs = [x_padded]
    # Grid-invariant weights/biases: constant index_map keeps them resident in
    # VMEM across batch tiles; single-buffering avoids a useless second copy.
    wb_kwargs = ({"pipeline_mode": pl.Buffered(1)}
                 if single_buffer_weights else {})
    for (w_p, b_p) in layers:
        in_specs.append(pl.BlockSpec(w_p.shape, lambda i: (0, 0), **wb_kwargs))
        in_specs.append(pl.BlockSpec(b_p.shape, lambda i: (0, 0), **wb_kwargs))
        flat_inputs.extend([w_p, b_p])

    return pl.pallas_call(
        kernel,
        out_shape=jax.ShapeDtypeStruct((batch, out_pad), x_padded.dtype),
        grid_spec=pltpu.PrefetchScalarGridSpec(
            num_scalar_prefetch=0,
            grid=(pl.cdiv(batch, tb),),          # partial last block is masked
            in_specs=in_specs,
            out_specs=pl.BlockSpec((tb, out_pad), lambda i: (i, 0)),
        ),
        compiler_params=pltpu.CompilerParams(
            # Batch tiles are independent -> megacore sharding on v7x.
            # NOTE(v7x): each TC then holds its own resident copy of all
            # weights; bf16 weight storage keeps that within 64 MiB budgets.
            dimension_semantics=("parallel",),
            vmem_limit_bytes=vmem_limit,
        ),
    )(*flat_inputs)


# ---------------------------------------------------------------------------
# Forward pass
# ---------------------------------------------------------------------------
def fused_mlp_forward(packed, x_padded, batch):
    """x_padded: (batch, in_pad) with the feature-dim zero pad already applied."""
    layers = packed["layers"]
    dims = packed["dims"]
    pdims = packed["padded_dims"]
    in_pad, out_pad = pdims[0], pdims[-1]
    max_pd = max(pdims)
    x_itemsize = jnp.dtype(x_padded.dtype).itemsize
    sub = _sublane_pack(x_padded.dtype)

    w_bytes = sum(int(w.size) * w.dtype.itemsize + int(b.size) * b.dtype.itemsize
                  for (w, b) in layers)

    def vmem_need(tb, w_bufs=2):
        io = 2 * tb * (in_pad + out_pad) * x_itemsize    # double-buffered I/O tiles
        inter = 3 * tb * max_pd * 4                      # f32 acc + ReLU + cast copy
        return io + w_bufs * w_bytes + inter

    vmem_cap = _vmem_capacity_bytes()
    budget = int(0.85 * vmem_cap)

    if batch >= 256:
        # Large batch: big tiles to amortize the ~0.35 us per-grid-step cost,
        # shrunk while the (conservative, double-buffered-weight) estimate
        # exceeds the per-core VMEM budget.
        tb = 1024 if batch >= 1024 else (512 if batch >= 512 else 256)
        while tb > 256 and vmem_need(tb) > budget:
            tb //= 2
        tb = max(tb, sub)
        # NOTE: if the padded weights alone exceed the budget, a fully
        # resident-weight design no longer fits (esp. v7x); an out-feature
        # (N)-tiled grid axis would be the next step -- not needed here.
    else:
        # Small batch: one block spanning the whole batch (block dim equal to
        # the full array dim is always legal, regardless of sublane packing).
        tb = batch

    vmem_limit = int(min(max(int(1.25 * vmem_need(tb)), 32 << 20), vmem_cap))

    try:
        out = _mlp_pallas_call(packed, x_padded, batch, tb, vmem_limit,
                               single_buffer_weights=True)
        jax.block_until_ready(out)   # surface any lowering/runtime issue here
    except Exception:
        # Fallback: default (double-buffered) specs -- the previously verified path.
        out = _mlp_pallas_call(packed, x_padded, batch, tb, vmem_limit,
                               single_buffer_weights=False)

    return out[:, :dims[-1]]


def split_into_heads(flat_outputs, output_sizes):
    # SplitIntoManyHeads with identity output activations (module default).
    outs = []
    start = 0
    for size in output_sizes:
        outs.append(flat_outputs[:, start:start + size])
        start += size
    return tuple(outs)


def concat_multiheaded_mlp_forward(packed, *inputs):
    # ConcatMultiHeadedMlp: concat along dim=1, MLP, split into heads.
    dims = packed["dims"]
    in_pad = packed["padded_dims"][0]
    batch = inputs[0].shape[0]
    in_size = sum(x.shape[1] for x in inputs)
    assert in_size == dims[0], "concatenated input width must match input_size"

    # Single pass: concat the inputs AND append the (required) feature-dim
    # zero pad in one XLA op -- no separate jnp.pad HBM round-trip, and no
    # batch-row padding at all (partial last grid block is masked instead).
    parts = list(inputs)
    pad_cols = in_pad - in_size
    if pad_cols:
        parts.append(jnp.zeros((batch, pad_cols), inputs[0].dtype))
    x_padded = jnp.concatenate(parts, axis=1)

    flat_outputs = fused_mlp_forward(packed, x_padded, batch)
    return split_into_heads(flat_outputs, packed["output_sizes"])
    # TODO(synk): layer_norm / dropout branches are off by default in the
    # PyTorch module and are not implemented here.


# ---------------------------------------------------------------------------
if __name__ == "__main__":
    key = jax.random.PRNGKey(0)
    batch = 2
    obs_dim, act_dim = 10, 6
    input_size = obs_dim + act_dim
    hidden_sizes = (32, 32)
    output_sizes = (5, 3)

    pkey, okey, akey = jax.random.split(key, 3)
    raw_params = init_params(pkey, input_size, hidden_sizes, sum(output_sizes))

    obs = jax.random.normal(okey, (batch, obs_dim), jnp.float32)
    act = jax.random.normal(akey, (batch, act_dim), jnp.float32)

    # pure-JAX reference (f32)
    x_ref = jnp.concatenate([obs, act], axis=1)
    h_ref = x_ref
    for (w, b) in raw_params[:-1]:
        h_ref = jnp.maximum(h_ref @ w.T + b, 0.0)
    flat_ref = h_ref @ raw_params[-1][0].T + raw_params[-1][1]

    # Production default: bf16 MXU operands, f32 accumulation/epilogue.
    packed_bf16 = pack_params(raw_params, input_size, output_sizes)
    heads_bf16 = concat_multiheaded_mlp_forward(packed_bf16, obs, act)
    jax.block_until_ready(heads_bf16)

    # f32 operand path for a tight numerical check of the kernel structure.
    packed_f32 = pack_params(raw_params, input_size, output_sizes,
                             matmul_dtype=jnp.float32)
    heads_f32 = concat_multiheaded_mlp_forward(packed_f32, obs, act)
    jax.block_until_ready(heads_f32)

    start = 0
    for head_b, head_f, size in zip(heads_bf16, heads_f32, output_sizes):
        ref_head = flat_ref[:, start:start + size]
        start += size
        assert head_b.shape == (batch, size)
        assert head_f.shape == (batch, size)
        assert jnp.allclose(head_f, ref_head, atol=1e-5), "f32 mismatch vs reference"
        assert jnp.allclose(head_b, ref_head, atol=2e-2, rtol=2e-2), \
            "bf16 mismatch vs reference"

    print("KERNEL_OK")
</pallas_src>

<mosaic_0001>
module attributes {stable_mosaic.version = 11 : i64} {
  func.func @_fused_mlp_kernel(%arg0: i32, %arg1: memref<2x128xf32, #tpu.memory_space<vmem>>, %arg2: memref<128x128xbf16, #tpu.memory_space<vmem>>, %arg3: memref<1x128xf32, #tpu.memory_space<vmem>>, %arg4: memref<128x128xbf16, #tpu.memory_space<vmem>>, %arg5: memref<1x128xf32, #tpu.memory_space<vmem>>, %arg6: memref<128x128xbf16, #tpu.memory_space<vmem>>, %arg7: memref<1x128xf32, #tpu.memory_space<vmem>>, %arg8: memref<2x128xf32, #tpu.memory_space<vmem>>) attributes {dimension_semantics = [#tpu.dimension_semantics<parallel>], iteration_bounds = array<i64: 1>, scalar_prefetch = 0 : i64, scratch_operands = 0 : i64, tpu.core_type = #tpu.core_type<tc>, window_params = [{transform_indices = @transform_0, window_bounds = array<i64: 2, 128>}, {pipeline_mode = #tpu.pipeline_mode<synchronous>, transform_indices = @transform_1, window_bounds = array<i64: 128, 128>}, {pipeline_mode = #tpu.pipeline_mode<synchronous>, transform_indices = @transform_2, window_bounds = array<i64: 1, 128>}, {pipeline_mode = #tpu.pipeline_mode<synchronous>, transform_indices = @transform_3, window_bounds = array<i64: 128, 128>}, {pipeline_mode = #tpu.pipeline_mode<synchronous>, transform_indices = @transform_4, window_bounds = array<i64: 1, 128>}, {pipeline_mode = #tpu.pipeline_mode<synchronous>, transform_indices = @transform_5, window_bounds = array<i64: 128, 128>}, {pipeline_mode = #tpu.pipeline_mode<synchronous>, transform_indices = @transform_6, window_bounds = array<i64: 1, 128>}, {transform_indices = @transform_7, window_bounds = array<i64: 2, 128>}]} {
    %c0 = arith.constant 0 : index
    %c0_0 = arith.constant 0 : index
    %0 = vector.load %arg1[%c0, %c0_0] : memref<2x128xf32, #tpu.memory_space<vmem>>, vector<2x128xf32>
    %1 = arith.truncf %0 : vector<2x128xf32> to vector<2x128xbf16>
    %c0_1 = arith.constant 0 : index
    %c0_2 = arith.constant 0 : index
    %2 = vector.load %arg2[%c0_1, %c0_2] : memref<128x128xbf16, #tpu.memory_space<vmem>>, vector<128x128xbf16>
    %cst = arith.constant dense<0.000000e+00> : vector<2x128xf32>
    %3 = tpu.matmul %1, %2, %cst {dimension_numbers = #tpu.dot_dimension_numbers<[1], [0], [0], [1], [0, 0, 1, 1], [], []>} : vector<2x128xbf16>, vector<128x128xbf16>, vector<2x128xf32> -> vector<2x128xf32>
    %c0_3 = arith.constant 0 : index
    %c0_4 = arith.constant 0 : index
    %4 = vector.load %arg3[%c0_3, %c0_4] : memref<1x128xf32, #tpu.memory_space<vmem>>, vector<1x128xf32>
    %5 = vector.broadcast %4 : vector<1x128xf32> to vector<2x128xf32>
    %6 = arith.addf %3, %5 : vector<2x128xf32>
    %cst_5 = arith.constant 0.000000e+00 : f32
    %7 = vector.broadcast %cst_5 : f32 to vector<2x128xf32>
    %8 = arith.maximumf %6, %7 : vector<2x128xf32>
    %9 = arith.truncf %8 : vector<2x128xf32> to vector<2x128xbf16>
    %c0_6 = arith.constant 0 : index
    %c0_7 = arith.constant 0 : index
    %10 = vector.load %arg4[%c0_6, %c0_7] : memref<128x128xbf16, #tpu.memory_space<vmem>>, vector<128x128xbf16>
    %cst_8 = arith.constant dense<0.000000e+00> : vector<2x128xf32>
    %11 = tpu.matmul %9, %10, %cst_8 {dimension_numbers = #tpu.dot_dimension_numbers<[1], [0], [0], [1], [0, 0, 1, 1], [], []>} : vector<2x128xbf16>, vector<128x128xbf16>, vector<2x128xf32> -> vector<2x128xf32>
    %c0_9 = arith.constant 0 : index
    %c0_10 = arith.constant 0 : index
    %12 = vector.load %arg5[%c0_9, %c0_10] : memref<1x128xf32, #tpu.memory_space<vmem>>, vector<1x128xf32>
    %13 = vector.broadcast %12 : vector<1x128xf32> to vector<2x128xf32>
    %14 = arith.addf %11, %13 : vector<2x128xf32>
    %cst_11 = arith.constant 0.000000e+00 : f32
    %15 = vector.broadcast %cst_11 : f32 to vector<2x128xf32>
    %16 = arith.maximumf %14, %15 : vector<2x128xf32>
    %17 = arith.truncf %16 : vector<2x128xf32> to vector<2x128xbf16>
    %c0_12 = arith.constant 0 : index
    %c0_13 = arith.constant 0 : index
    %18 = vector.load %arg6[%c0_12, %c0_13] : memref<128x128xbf16, #tpu.memory_space<vmem>>, vector<128x128xbf16>
    %cst_14 = arith.constant dense<0.000000e+00> : vector<2x128xf32>
    %19 = tpu.matmul %17, %18, %cst_14 {dimension_numbers = #tpu.dot_dimension_numbers<[1], [0], [0], [1], [0, 0, 1, 1], [], []>} : vector<2x128xbf16>, vector<128x128xbf16>, vector<2x128xf32> -> vector<2x128xf32>
    %c0_15 = arith.constant 0 : index
    %c0_16 = arith.constant 0 : index
    %20 = vector.load %arg7[%c0_15, %c0_16] : memref<1x128xf32, #tpu.memory_space<vmem>>, vector<1x128xf32>
    %21 = vector.broadcast %20 : vector<1x128xf32> to vector<2x128xf32>
    %22 = arith.addf %19, %21 : vector<2x128xf32>
    %c0_17 = arith.constant 0 : index
    %c0_18 = arith.constant 0 : index
    %23 = vector.load %arg8[%c0_17, %c0_18] : memref<2x128xf32, #tpu.memory_space<vmem>>, vector<2x128xf32>
    tpu.vector_store %arg8[%c0_17, %c0_18], %22 {strides = array<i32>} : memref<2x128xf32, #tpu.memory_space<vmem>>, vector<2x128xf32>,
    return
  }
  func.func @transform_0(%arg0: i32) -> (i32, i32) {
    %c0_i32 = arith.constant 0 : i32
    %c0_i32_0 = arith.constant 0 : i32
    return %arg0, %c0_i32 : i32, i32
  }
  func.func @transform_1(%arg0: i32) -> (i32, i32) {
    %c0_i32 = arith.constant 0 : i32
    %c0_i32_0 = arith.constant 0 : i32
    %c0_i32_1 = arith.constant 0 : i32
    return %c0_i32, %c0_i32_0 : i32, i32
  }
  func.func @transform_2(%arg0: i32) -> (i32, i32) {
    %c0_i32 = arith.constant 0 : i32
    %c0_i32_0 = arith.constant 0 : i32
    %c0_i32_1 = arith.constant 0 : i32
    return %c0_i32, %c0_i32_0 : i32, i32
  }
  func.func @transform_3(%arg0: i32) -> (i32, i32) {
    %c0_i32 = arith.constant 0 : i32
    %c0_i32_0 = arith.constant 0 : i32
    %c0_i32_1 = arith.constant 0 : i32
    return %c0_i32, %c0_i32_0 : i32, i32
  }
  func.func @transform_4(%arg0: i32) -> (i32, i32) {
    %c0_i32 = arith.constant 0 : i32
    %c0_i32_0 = arith.constant 0 : i32
    %c0_i32_1 = arith.constant 0 : i32
    return %c0_i32, %c0_i32_0 : i32, i32
  }
  func.func @transform_5(%arg0: i32) -> (i32, i32) {
    %c0_i32 = arith.constant 0 : i32
    %c0_i32_0 = arith.constant 0 : i32
    %c0_i32_1 = arith.constant 0 : i32
    return %c0_i32, %c0_i32_0 : i32, i32
  }
  func.func @transform_6(%arg0: i32) -> (i32, i32) {
    %c0_i32 = arith.constant 0 : i32
    %c0_i32_0 = arith.constant 0 : i32
    %c0_i32_1 = arith.constant 0 : i32
    return %c0_i32, %c0_i32_0 : i32, i32
  }
  func.func @transform_7(%arg0: i32) -> (i32, i32) {
    %c0_i32 = arith.constant 0 : i32
    %c0_i32_0 = arith.constant 0 : i32
    return %arg0, %c0_i32 : i32, i32
  }
}

module attributes {stable_mosaic.version = 11 : i64} {
  func.func @_fused_mlp_kernel(%arg0: i32, %arg1: memref<2x128xf32, #tpu.memory_space<vmem>>, %arg2: memref<128x128xbf16, #tpu.memory_space<vmem>>, %arg3: memref<1x128xf32, #tpu.memory_space<vmem>>, %arg4: memref<128x128xbf16, #tpu.memory_space<vmem>>, %arg5: memref<1x128xf32, #tpu.memory_space<vmem>>, %arg6: memref<128x128xbf16, #tpu.memory_space<vmem>>, %arg7: memref<1x128xf32, #tpu.memory_space<vmem>>, %arg8: memref<2x128xf32, #tpu.memory_space<vmem>>) attributes {dimension_semantics = [#tpu.dimension_semantics<parallel>], iteration_bounds = array<i64: 1>, scalar_prefetch = 0 : i64, scratch_operands = 0 : i64, tpu.core_type = #tpu.core_type<tc>, window_params = [{transform_indices = @transform_0, window_bounds = array<i64: 2, 128>}, {pipeline_mode = #tpu.pipeline_mode<synchronous>, transform_indices = @transform_1, window_bounds = array<i64: 128, 128>}, {pipeline_mode = #tpu.pipeline_mode<synchronous>, transform_indices = @transform_2, window_bounds = array<i64: 1, 128>}, {pipeline_mode = #tpu.pipeline_mode<synchronous>, transform_indices = @transform_3, window_bounds = array<i64: 128, 128>}, {pipeline_mode = #tpu.pipeline_mode<synchronous>, transform_indices = @transform_4, window_bounds = array<i64: 1, 128>}, {pipeline_mode = #tpu.pipeline_mode<synchronous>, transform_indices = @transform_5, window_bounds = array<i64: 128, 128>}, {pipeline_mode = #tpu.pipeline_mode<synchronous>, transform_indices = @transform_6, window_bounds = array<i64: 1, 128>}, {transform_indices = @transform_7, window_bounds = array<i64: 2, 128>}]} {
    %c0 = arith.constant 0 : index
    %c0_0 = arith.constant 0 : index
    %0 = vector.load %arg1[%c0, %c0_0] : memref<2x128xf32, #tpu.memory_space<vmem>>, vector<2x128xf32>
    %1 = arith.truncf %0 : vector<2x128xf32> to vector<2x128xbf16>
    %c0_1 = arith.constant 0 : index
    %c0_2 = arith.constant 0 : index
    %2 = vector.load %arg2[%c0_1, %c0_2] : memref<128x128xbf16, #tpu.memory_space<vmem>>, vector<128x128xbf16>
    %cst = arith.constant dense<0.000000e+00> : vector<2x128xf32>
    %3 = tpu.matmul %1, %2, %cst {dimension_numbers = #tpu.dot_dimension_numbers<[1], [0], [0], [1], [0, 0, 1, 1], [], []>} : vector<2x128xbf16>, vector<128x128xbf16>, vector<2x128xf32> -> vector<2x128xf32>
    %c0_3 = arith.constant 0 : index
    %c0_4 = arith.constant 0 : index
    %4 = vector.load %arg3[%c0_3, %c0_4] : memref<1x128xf32, #tpu.memory_space<vmem>>, vector<1x128xf32>
    %5 = vector.broadcast %4 : vector<1x128xf32> to vector<2x128xf32>
    %6 = arith.addf %3, %5 : vector<2x128xf32>
    %cst_5 = arith.constant 0.000000e+00 : f32
    %7 = vector.broadcast %cst_5 : f32 to vector<2x128xf32>
    %8 = arith.maximumf %6, %7 : vector<2x128xf32>
    %9 = arith.truncf %8 : vector<2x128xf32> to vector<2x128xbf16>
    %c0_6 = arith.constant 0 : index
    %c0_7 = arith.constant 0 : index
    %10 = vector.load %arg4[%c0_6, %c0_7] : memref<128x128xbf16, #tpu.memory_space<vmem>>, vector<128x128xbf16>
    %cst_8 = arith.constant dense<0.000000e+00> : vector<2x128xf32>
    %11 = tpu.matmul %9, %10, %cst_8 {dimension_numbers = #tpu.dot_dimension_numbers<[1], [0], [0], [1], [0, 0, 1, 1], [], []>} : vector<2x128xbf16>, vector<128x128xbf16>, vector<2x128xf32> -> vector<2x128xf32>
    %c0_9 = arith.constant 0 : index
    %c0_10 = arith.constant 0 : index
    %12 = vector.load %arg5[%c0_9, %c0_10] : memref<1x128xf32, #tpu.memory_space<vmem>>, vector<1x128xf32>
    %13 = vector.broadcast %12 : vector<1x128xf32> to vector<2x128xf32>
    %14 = arith.addf %11, %13 : vector<2x128xf32>
    %cst_11 = arith.constant 0.000000e+00 : f32
    %15 = vector.broadcast %cst_11 : f32 to vector<2x128xf32>
    %16 = arith.maximumf %14, %15 : vector<2x128xf32>
    %17 = arith.truncf %16 : vector<2x128xf32> to vector<2x128xbf16>
    %c0_12 = arith.constant 0 : index
    %c0_13 = arith.constant 0 : index
    %18 = vector.load %arg6[%c0_12, %c0_13] : memref<128x128xbf16, #tpu.memory_space<vmem>>, vector<128x128xbf16>
    %cst_14 = arith.constant dense<0.000000e+00> : vector<2x128xf32>
    %19 = tpu.matmul %17, %18, %cst_14 {dimension_numbers = #tpu.dot_dimension_numbers<[1], [0], [0], [1], [0, 0, 1, 1], [], []>} : vector<2x128xbf16>, vector<128x128xbf16>, vector<2x128xf32> -> vector<2x128xf32>
    %c0_15 = arith.constant 0 : index
    %c0_16 = arith.constant 0 : index
    %20 = vector.load %arg7[%c0_15, %c0_16] : memref<1x128xf32, #tpu.memory_space<vmem>>, vector<1x128xf32>
    %21 = vector.broadcast %20 : vector<1x128xf32> to vector<2x128xf32>
    %22 = arith.addf %19, %21 : vector<2x128xf32>
    %c0_17 = arith.constant 0 : index
    %c0_18 = arith.constant 0 : index
    %23 = vector.load %arg8[%c0_17, %c0_18] : memref<2x128xf32, #tpu.memory_space<vmem>>, vector<2x128xf32>
    tpu.vector_store %arg8[%c0_17, %c0_18], %22 {strides = array<i32>} : memref<2x128xf32, #tpu.memory_space<vmem>>, vector<2x128xf32>,
    return
  }
  func.func @transform_0(%arg0: i32) -> (i32, i32) {
    %c0_i32 = arith.constant 0 : i32
    %c0_i32_0 = arith.constant 0 : i32
    return %arg0, %c0_i32 : i32, i32
  }
  func.func @transform_1(%arg0: i32) -> (i32, i32) {
    %c0_i32 = arith.constant 0 : i32
    %c0_i32_0 = arith.constant 0 : i32
    %c0_i32_1 = arith.constant 0 : i32
    return %c0_i32, %c0_i32_0 : i32, i32
  }
  func.func @transform_2(%arg0: i32) -> (i32, i32) {
    %c0_i32 = arith.constant 0 : i32
    %c0_i32_0 = arith.constant 0 : i32
    %c0_i32_1 = arith.constant 0 : i32
    return %c0_i32, %c0_i32_0 : i32, i32
  }
  func.func @transform_3(%arg0: i32) -> (i32, i32) {
    %c0_i32 = arith.constant 0 : i32
    %c0_i32_0 = arith.constant 0 : i32
    %c0_i32_1 = arith.constant 0 : i32
    return %c0_i32, %c0_i32_0 : i32, i32
  }
  func.func @transform_4(%arg0: i32) -> (i32, i32) {
    %c0_i32 = arith.constant 0 : i32
    %c0_i32_0 = arith.constant 0 : i32
    %c0_i32_1 = arith.constant 0 : i32
    return %c0_i32, %c0_i32_0 : i32, i32
  }
  func.func @transform_5(%arg0: i32) -> (i32, i32) {
    %c0_i32 = arith.constant 0 : i32
    %c0_i32_0 = arith.constant 0 : i32
    %c0_i32_1 = arith.constant 0 : i32
    return %c0_i32, %c0_i32_0 : i32, i32
  }
  func.func @transform_6(%arg0: i32) -> (i32, i32) {
    %c0_i32 = arith.constant 0 : i32
    %c0_i32_0 = arith.constant 0 : i32
    %c0_i32_1 = arith.constant 0 : i32
    return %c0_i32, %c0_i32_0 : i32, i32
  }
  func.func @transform_7(%arg0: i32) -> (i32, i32) {
    %c0_i32 = arith.constant 0 : i32
    %c0_i32_0 = arith.constant 0 : i32
    return %arg0, %c0_i32 : i32, i32
  }
}

</mosaic_0001>

<bundles_post_ra>
// kernel: tpu_custom_call.1
= control target key start
LH: loop header
LB: loop body
LE: loop exit
PB: predicated region body
PF: predicated region fallthrough
CT: control target
= control target key end

     0   :  { %12 = vsyncpa [#allocation3], 0  ;;  %s686_s0 = inlined_call_operand.hbm [shape: f32[2,128], index: 0, kind: input, shape index: {}]   ;;  %s687_s1 = inlined_call_operand.hbm [shape: bf16[128,128], index: 1, kind: input, shape index: {}]   ;;  %s688_s2 = inlined_call_operand.vmem [shape: f32[1,128], index: 2, kind: input, shape index: {}]   ;;  %s689_s3 = inlined_call_operand.hbm [shape: bf16[128,128], index: 3, kind: input, shape index: {}]   ;;  %s690_s4 = inlined_call_operand.vmem [shape: f32[1,128], index: 4, kind: input, shape index: {}]   ;;  %s691_s5 = inlined_call_operand.hbm [shape: bf16[128,128], index: 5, kind: input, shape index: {}]   ;;  %s692_s6 = inlined_call_operand.vmem [shape: f32[1,128], index: 6, kind: input, shape index: {}]   ;;  %s693_s7 = inlined_call_operand.hbm [shape: f32[2,128], index: 7, kind: output, shape index: {}]  }
   0x1   :  { %13 = vsyncpa [#allocation6], 0 }
   0x2   :  { %14 = vsyncpa [#allocation9], 0  ;;  %s31_s26 = sshll.u32 %s687_s1, 4  ;;  %s32_s26 = int_to_ptr.hbm [resolvable:$true] %s31_s26 }
   0x3   :  { %15 = vsyncpa [#allocation4], 0  ;;  %s615_s27 = smov [#allocation5]   ;;  %s21_s8 = sshll.u32 %s686_s0, 4  ;;  %s22_s8 = int_to_ptr.hbm [resolvable:$true] %s21_s8 }
   0x4   :  { %s33_s28 = sshll.u32 %s615_s27, 4  ;;  %s616_s9 = smov 64   ;;  %s34_s28 = int_to_ptr.vmem [resolvable:$true] %s33_s28 }
   0x5   :  { %s617_s10 = smov 4   ;;  %s618_s11 = smov [#allocation2]  }
   0x6   :  { %39 = dma.hbm_to_vmem [thread:$0]  %s32_s26, 1024, %s34_s28, [#allocation6], %s616_s9, %s616_s9, %s617_s10  }
   0x7   :  { %s23_s12 = sshll.u32 %s618_s11, 4  ;;  %s46_s15 = sshll.u32 %s689_s3, 4  ;;  %s24_s12 = int_to_ptr.vmem [resolvable:$true] %s23_s12  ;;  %s47_s15 = int_to_ptr.hbm [resolvable:$true] %s46_s15 }
   0x8   :  { %26 = dma.hbm_to_vmem [thread:$0]  %s22_s8, 32, %s24_s12, [#allocation3]  }
   0x9   :  { %s61_s17 = sshll.u32 %s691_s5, 4  ;;  %s619_s18 = smov [#allocation7]   ;;  %s62_s17 = int_to_ptr.hbm [resolvable:$true] %s61_s17 }
   0xa   :  { %s48_s19 = sshll.u32 %s619_s18, 4  ;;  %s620_s0 = smov [#allocation8]   ;;  %s49_s19 = int_to_ptr.vmem [resolvable:$true] %s48_s19 }
   0xb   :  { %54 = dma.hbm_to_vmem [thread:$0]  %s47_s15, 1024, %s49_s19, [#allocation6], %s616_s9, %s616_s9, %s617_s10  }
   0xc   :  { %s63_s20 = sshll.u32 %s620_s0, 4  ;;  %s64_s20 = int_to_ptr.vmem [resolvable:$true] %s63_s20 }
   0xd   :  { %69 = dma.hbm_to_vmem [thread:$0]  %s62_s17, 1024, %s64_s20, [#allocation9], %s616_s9, %s616_s9, %s617_s10  }
   0xe   :  { %607 = dma.done.wait [#allocation3], 32  }
   0xf   :  { %608 = vsyncadd [#allocation3], 4294967264 }
  0x10   :  { %609 = dma.done.wait [#allocation6], 2048  }
  0x11   :  { %610 = vsyncadd [#allocation6], 4294965248 }
  0x12   :  { %611 = dma.done.wait [#allocation9], 1024  }
  0x13   :  { %612 = vsyncadd [#allocation9], 4294966272  ;;  %v460_v0 = vld [vmem:[#allocation5 + $0x38] sm:$0xff]  ;;  %v459_v1 = vld [vmem:[#allocation5 + $0x30] sm:$0xff]  ;;  %s621_s24 = smov [#allocation10]   ;;  %s345_s28 = sshll.u32 %s693_s7, 4  ;;  %s346_s28 = int_to_ptr.hbm [resolvable:$true] %s345_s28 }
  0x14   :  { %158 = vmatpush.bf16.msra.mxu0 %v460_v0  ;;  %v468_v2 = vld [vmem:[#allocation7 + $0x38] sm:$0xff]  ;;  %v467_v3 = vld [vmem:[#allocation7 + $0x30] sm:$0xff]  ;;  %v458_v4 = vld [vmem:[#allocation5 + $0x28] sm:$0xff]  ;;  %s343_s25 = sshll.u32 %s621_s24, 4  ;;  %s344_s25 = int_to_ptr.vmem [resolvable:$true] %s343_s25 }
  0x15   :  { %241 = vmatpush.bf16.msra.mxu1 %v468_v2  ;;  %v466_v5 = vld [vmem:[#allocation7 + $0x28] sm:$0xff]  ;;  %v457_v6 = vld [vmem:[#allocation5 + $0x20] sm:$0xff]  ;;  %v456_v8 = vld [vmem:[#allocation5 + $0x18] sm:$0xff] }
  0x16   :  { %v465_v7 = vld [vmem:[#allocation7 + $0x20] sm:$0xff]  ;;  %v464_v9 = vld [vmem:[#allocation7 + $0x18] sm:$0xff]  ;;  %v455_v10 = vld [vmem:[#allocation5 + $0x10] sm:$0xff] }
  0x17   :  { %v463_v11 = vld [vmem:[#allocation7 + $0x10] sm:$0xff]  ;;  %v454_v12 = vld [vmem:[#allocation5 + $0x8] sm:$0xff]  ;;  %v453_v13 = vld [vmem:[#allocation5] sm:$0xff] }
  0x18   :  { %159 = vmatpush.bf16.msra.mxu0 %v459_v1  ;;  %v88_v14 = vld [vmem:[#allocation2] sm:$0x3]  ;;  %v462_v16 = vld [vmem:[#allocation7 + $0x8] sm:$0xff]  ;;  %v461_v17 = vld [vmem:[#allocation7] sm:$0xff] }
  0x19   :  { %242 = vmatpush.bf16.msra.mxu1 %v467_v3  ;;  %v89_v15 = vpack.c.bf16 %v88_v14, %v88_v14  ;;  %v476_v18 = vld [vmem:[#allocation8 + $0x38] sm:$0xff]  ;;  %v475_v19 = vld [vmem:[#allocation8 + $0x30] sm:$0xff]  ;;  %v474_v20 = vld [vmem:[#allocation8 + $0x28] sm:$0xff] }
  0x1a   :  { %324 = vmatpush.bf16.msra.mxu2 %v476_v18  ;;  %v473_v21 = vld [vmem:[#allocation8 + $0x20] sm:$0xff]  ;;  %v472_v22 = vld [vmem:[#allocation8 + $0x18] sm:$0xff]  ;;  %v471_v23 = vld [vmem:[#allocation8 + $0x10] sm:$0xff] }
  0x1b   :  { %v484_v24 = vld [vmem:[%s688_s2] ss:$0 sm:$0xff]  ;;  %v470_v30 = vld [vmem:[#allocation8 + $0x8] sm:$0xff]  ;;  %v469_v31 = vld [vmem:[#allocation8] sm:$0xff] }
  0x1c   :  { %160 = vmatpush.bf16.msra.mxu0 %v458_v4  ;;  %v485_v32 = vld [vmem:[%s690_s4] ss:$0 sm:$0xff] }
  0x1d   :  { %243 = vmatpush.bf16.msra.mxu1 %v466_v5  ;;  %v486_v38 = vld [vmem:[%s692_s6] ss:$0 sm:$0xff] }
  0x1e   :  { %325 = vmatpush.bf16.msra.mxu2 %v475_v19 }
  0x20   :  { %161 = vmatpush.bf16.msra.mxu0 %v457_v6 }
  0x21   :  { %244 = vmatpush.bf16.msra.mxu1 %v465_v7 }
  0x22   :  { %326 = vmatpush.bf16.msra.mxu2 %v474_v20 }
  0x24   :  { %162 = vmatpush.bf16.msra.mxu0 %v456_v8 }
  0x25   :  { %245 = vmatpush.bf16.msra.mxu1 %v464_v9 }
  0x26   :  { %327 = vmatpush.bf16.msra.mxu2 %v473_v21 }
  0x28   :  { %163 = vmatpush.bf16.msra.mxu0 %v455_v10 }
  0x29   :  { %246 = vmatpush.bf16.msra.mxu1 %v463_v11 }
  0x2a   :  { %328 = vmatpush.bf16.msra.mxu2 %v472_v22 }
  0x2c   :  { %164 = vmatpush.bf16.msra.mxu0 %v454_v12 }
  0x2d   :  { %247 = vmatpush.bf16.msra.mxu1 %v462_v16 }
  0x2e   :  { %329 = vmatpush.bf16.msra.mxu2 %v471_v23 }
  0x30   :  { %165 = vmatpush.bf16.msra.mxu0 %v453_v13 }
  0x31   :  { %248 = vmatpush.bf16.msra.mxu1 %v461_v17 }
  0x32   :  { %330 = vmatpush.bf16.msra.mxu2 %v470_v30 }
  0x33   :  { %166 = vmatmul.bf16.vlgmr.msra.gmra.mxu0 %v89_v15 }
  0x36   :  { %331 = vmatpush.bf16.msra.mxu2 %v469_v31 }
  0xb0   :  { %v167_v25 = vpop.f32.mrf.mxu0 }
  0xb1   :  { %v168_v26 = vadd.f32 %v484_v24, %v167_v25 }
  0xb3   :  { %v171_v27 = vmax.f32 %v168_v26, 0.0 }
  0xb5   :  { %v172_v28 = vpack.c.bf16 %v171_v27, %v171_v27 }
  0xb7   :  { %249 = vmatmul.bf16.vlgmr.msra.gmra.mxu1 %v172_v28 }
  0xb8   :  { %v169_v29 = vpop.f32.mrf.mxu0 }
 0x134   :  { %v250_v33 = vpop.f32.mrf.mxu1 }
 0x135   :  { %v251_v34 = vadd.f32 %v485_v32, %v250_v33 }
 0x137   :  { %v254_v35 = vmax.f32 %v251_v34, 0.0 }
 0x139   :  { %v255_v36 = vpack.c.bf16 %v254_v35, %v254_v35 }
 0x13b   :  { %332 = vmatmul.bf16.vlgmr.msra.gmra.mxu2 %v255_v36 }
 0x13c   :  { %v252_v37 = vpop.f32.mrf.mxu1 }
 0x1be   :  { %v333_v39 = vpop.f32.mrf.mxu2 }
 0x1bf   :  { %v334_v40 = vadd.f32 %v486_v38, %v333_v39 }
 0x1c1   :  { %337 = vst [vmem:[#allocation10] sm:$0x3] %v334_v40 }
 0x1c2   :  { %348 = dma.vmem_to_hbm [thread:$0]  %s344_s25, 32, %s346_s28, [#allocation4]  }
 0x1c6   :  { %v335_v41 = vpop.f32.mrf.mxu2 }
 0x1c7   :  { %613 = dma.done.wait [#allocation4], 32  }
 0x1c8   :  { %614 = vsyncadd [#allocation4], 4294967264 }
 0x1c9   :  { %353 = vsyncpa [#allocation3], 1 }
 0x1ca   :  { %354 = vsyncpa [#allocation6], 1 }
 0x1cb   :  { %355 = vsyncpa [#allocation9], 1 }
 0x1cc   :  { %356 = vsyncpa [#allocation4], 1 }

// kernel: tpu_custom_call.1
= control target key start
LH: loop header
LB: loop body
LE: loop exit
PB: predicated region body
PF: predicated region fallthrough
CT: control target
= control target key end

     0   :  { %12 = vsyncpa [#allocation3], 0  ;;  %s686_s0 = inlined_call_operand.hbm [shape: f32[2,128], index: 0, kind: input, shape index: {}]   ;;  %s687_s1 = inlined_call_operand.hbm [shape: bf16[128,128], index: 1, kind: input, shape index: {}]   ;;  %s688_s2 = inlined_call_operand.vmem [shape: f32[1,128], index: 2, kind: input, shape index: {}]   ;;  %s689_s3 = inlined_call_operand.hbm [shape: bf16[128,128], index: 3, kind: input, shape index: {}]   ;;  %s690_s4 = inlined_call_operand.vmem [shape: f32[1,128], index: 4, kind: input, shape index: {}]   ;;  %s691_s5 = inlined_call_operand.hbm [shape: bf16[128,128], index: 5, kind: input, shape index: {}]   ;;  %s692_s6 = inlined_call_operand.vmem [shape: f32[1,128], index: 6, kind: input, shape index: {}]   ;;  %s693_s7 = inlined_call_operand.hbm [shape: f32[2,128], index: 7, kind: output, shape index: {}]  }
   0x1   :  { %13 = vsyncpa [#allocation6], 0 }
   0x2   :  { %14 = vsyncpa [#allocation9], 0  ;;  %s31_s26 = sshll.u32 %s687_s1, 4  ;;  %s32_s26 = int_to_ptr.hbm [resolvable:$true] %s31_s26 }
   0x3   :  { %15 = vsyncpa [#allocation4], 0  ;;  %s615_s27 = smov [#allocation5]   ;;  %s21_s8 = sshll.u32 %s686_s0, 4  ;;  %s22_s8 = int_to_ptr.hbm [resolvable:$true] %s21_s8 }
   0x4   :  { %s33_s28 = sshll.u32 %s615_s27, 4  ;;  %s616_s9 = smov 64   ;;  %s34_s28 = int_to_ptr.vmem [resolvable:$true] %s33_s28 }
   0x5   :  { %s617_s10 = smov 4   ;;  %s618_s11 = smov [#allocation2]  }
   0x6   :  { %39 = dma.hbm_to_vmem [thread:$0]  %s32_s26, 1024, %s34_s28, [#allocation6], %s616_s9, %s616_s9, %s617_s10  }
   0x7   :  { %s23_s12 = sshll.u32 %s618_s11, 4  ;;  %s46_s15 = sshll.u32 %s689_s3, 4  ;;  %s24_s12 = int_to_ptr.vmem [resolvable:$true] %s23_s12  ;;  %s47_s15 = int_to_ptr.hbm [resolvable:$true] %s46_s15 }
   0x8   :  { %26 = dma.hbm_to_vmem [thread:$0]  %s22_s8, 32, %s24_s12, [#allocation3]  }
   0x9   :  { %s61_s17 = sshll.u32 %s691_s5, 4  ;;  %s619_s18 = smov [#allocation7]   ;;  %s62_s17 = int_to_ptr.hbm [resolvable:$true] %s61_s17 }
   0xa   :  { %s48_s19 = sshll.u32 %s619_s18, 4  ;;  %s620_s0 = smov [#allocation8]   ;;  %s49_s19 = int_to_ptr.vmem [resolvable:$true] %s48_s19 }
   0xb   :  { %54 = dma.hbm_to_vmem [thread:$0]  %s47_s15, 1024, %s49_s19, [#allocation6], %s616_s9, %s616_s9, %s617_s10  }
   0xc   :  { %s63_s20 = sshll.u32 %s620_s0, 4  ;;  %s64_s20 = int_to_ptr.vmem [resolvable:$true] %s63_s20 }
   0xd   :  { %69 = dma.hbm_to_vmem [thread:$0]  %s62_s17, 1024, %s64_s20, [#allocation9], %s616_s9, %s616_s9, %s617_s10  }
   0xe   :  { %607 = dma.done.wait [#allocation3], 32  }
   0xf   :  { %608 = vsyncadd [#allocation3], 4294967264 }
  0x10   :  { %609 = dma.done.wait [#allocation6], 2048  }
  0x11   :  { %610 = vsyncadd [#allocation6], 4294965248 }
  0x12   :  { %611 = dma.done.wait [#allocation9], 1024  }
  0x13   :  { %612 = vsyncadd [#allocation9], 4294966272  ;;  %v460_v0 = vld [vmem:[#allocation5 + $0x38] sm:$0xff]  ;;  %v459_v1 = vld [vmem:[#allocation5 + $0x30] sm:$0xff]  ;;  %s621_s24 = smov [#allocation10]   ;;  %s345_s28 = sshll.u32 %s693_s7, 4  ;;  %s346_s28 = int_to_ptr.hbm [resolvable:$true] %s345_s28 }
  0x14   :  { %158 = vmatpush.bf16.msra.mxu0 %v460_v0  ;;  %v468_v2 = vld [vmem:[#allocation7 + $0x38] sm:$0xff]  ;;  %v467_v3 = vld [vmem:[#allocation7 + $0x30] sm:$0xff]  ;;  %v458_v4 = vld [vmem:[#allocation5 + $0x28] sm:$0xff]  ;;  %s343_s25 = sshll.u32 %s621_s24, 4  ;;  %s344_s25 = int_to_ptr.vmem [resolvable:$true] %s343_s25 }
  0x15   :  { %241 = vmatpush.bf16.msra.mxu1 %v468_v2  ;;  %v466_v5 = vld [vmem:[#allocation7 + $0x28] sm:$0xff]  ;;  %v457_v6 = vld [vmem:[#allocation5 + $0x20] sm:$0xff]  ;;  %v456_v8 = vld [vmem:[#allocation5 + $0x18] sm:$0xff] }
  0x16   :  { %v465_v7 = vld [vmem:[#allocation7 + $0x20] sm:$0xff]  ;;  %v464_v9 = vld [vmem:[#allocation7 + $0x18] sm:$0xff]  ;;  %v455_v10 = vld [vmem:[#allocation5 + $0x10] sm:$0xff] }
  0x17   :  { %v463_v11 = vld [vmem:[#allocation7 + $0x10] sm:$0xff]  ;;  %v454_v12 = vld [vmem:[#allocation5 + $0x8] sm:$0xff]  ;;  %v453_v13 = vld [vmem:[#allocation5] sm:$0xff] }
  0x18   :  { %159 = vmatpush.bf16.msra.mxu0 %v459_v1  ;;  %v88_v14 = vld [vmem:[#allocation2] sm:$0x3]  ;;  %v462_v16 = vld [vmem:[#allocation7 + $0x8] sm:$0xff]  ;;  %v461_v17 = vld [vmem:[#allocation7] sm:$0xff] }
  0x19   :  { %242 = vmatpush.bf16.msra.mxu1 %v467_v3  ;;  %v89_v15 = vpack.c.bf16 %v88_v14, %v88_v14  ;;  %v476_v18 = vld [vmem:[#allocation8 + $0x38] sm:$0xff]  ;;  %v475_v19 = vld [vmem:[#allocation8 + $0x30] sm:$0xff]  ;;  %v474_v20 = vld [vmem:[#allocation8 + $0x28] sm:$0xff] }
  0x1a   :  { %324 = vmatpush.bf16.msra.mxu2 %v476_v18  ;;  %v473_v21 = vld [vmem:[#allocation8 + $0x20] sm:$0xff]  ;;  %v472_v22 = vld [vmem:[#allocation8 + $0x18] sm:$0xff]  ;;  %v471_v23 = vld [vmem:[#allocation8 + $0x10] sm:$0xff] }
  0x1b   :  { %v484_v24 = vld [vmem:[%s688_s2] ss:$0 sm:$0xff]  ;;  %v470_v30 = vld [vmem:[#allocation8 + $0x8] sm:$0xff]  ;;  %v469_v31 = vld [vmem:[#allocation8] sm:$0xff] }
  0x1c   :  { %160 = vmatpush.bf16.msra.mxu0 %v458_v4  ;;  %v485_v32 = vld [vmem:[%s690_s4] ss:$0 sm:$0xff] }
  0x1d   :  { %243 = vmatpush.bf16.msra.mxu1 %v466_v5  ;;  %v486_v38 = vld [vmem:[%s692_s6] ss:$0 sm:$0xff] }
  0x1e   :  { %325 = vmatpush.bf16.msra.mxu2 %v475_v19 }
  0x20   :  { %161 = vmatpush.bf16.msra.mxu0 %v457_v6 }
  0x21   :  { %244 = vmatpush.bf16.msra.mxu1 %v465_v7 }
  0x22   :  { %326 = vmatpush.bf16.msra.mxu2 %v474_v20 }
  0x24   :  { %162 = vmatpush.bf16.msra.mxu0 %v456_v8 }
  0x25   :  { %245 = vmatpush.bf16.msra.mxu1 %v464_v9 }
  0x26   :  { %327 = vmatpush.bf16.msra.mxu2 %v473_v21 }
  0x28   :  { %163 = vmatpush.bf16.msra.mxu0 %v455_v10 }
  0x29   :  { %246 = vmatpush.bf16.msra.mxu1 %v463_v11 }
  0x2a   :  { %328 = vmatpush.bf16.msra.mxu2 %v472_v22 }
  0x2c   :  { %164 = vmatpush.bf16.msra.mxu0 %v454_v12 }
  0x2d   :  { %247 = vmatpush.bf16.msra.mxu1 %v462_v16 }
  0x2e   :  { %329 = vmatpush.bf16.msra.mxu2 %v471_v23 }
  0x30   :  { %165 = vmatpush.bf16.msra.mxu0 %v453_v13 }
  0x31   :  { %248 = vmatpush.bf16.msra.mxu1 %v461_v17 }
  0x32   :  { %330 = vmatpush.bf16.msra.mxu2 %v470_v30 }
  0x33   :  { %166 = vmatmul.bf16.vlgmr.msra.gmra.mxu0 %v89_v15 }
  0x36   :  { %331 = vmatpush.bf16.msra.mxu2 %v469_v31 }
  0xb0   :  { %v167_v25 = vpop.f32.mrf.mxu0 }
  0xb1   :  { %v168_v26 = vadd.f32 %v484_v24, %v167_v25 }
  0xb3   :  { %v171_v27 = vmax.f32 %v168_v26, 0.0 }
  0xb5   :  { %v172_v28 = vpack.c.bf16 %v171_v27, %v171_v27 }
  0xb7   :  { %249 = vmatmul.bf16.vlgmr.msra.gmra.mxu1 %v172_v28 }
  0xb8   :  { %v169_v29 = vpop.f32.mrf.mxu0 }
 0x134   :  { %v250_v33 = vpop.f32.mrf.mxu1 }
 0x135   :  { %v251_v34 = vadd.f32 %v485_v32, %v250_v33 }
 0x137   :  { %v254_v35 = vmax.f32 %v251_v34, 0.0 }
 0x139   :  { %v255_v36 = vpack.c.bf16 %v254_v35, %v254_v35 }
 0x13b   :  { %332 = vmatmul.bf16.vlgmr.msra.gmra.mxu2 %v255_v36 }
 0x13c   :  { %v252_v37 = vpop.f32.mrf.mxu1 }
 0x1be   :  { %v333_v39 = vpop.f32.mrf.mxu2 }
 0x1bf   :  { %v334_v40 = vadd.f32 %v486_v38, %v333_v39 }
 0x1c1   :  { %337 = vst [vmem:[#allocation10] sm:$0x3] %v334_v40 }
 0x1c2   :  { %348 = dma.vmem_to_hbm [thread:$0]  %s344_s25, 32, %s346_s28, [#allocation4]  }
 0x1c6   :  { %v335_v41 = vpop.f32.mrf.mxu2 }
 0x1c7   :  { %613 = dma.done.wait [#allocation4], 32  }
 0x1c8   :  { %614 = vsyncadd [#allocation4], 4294967264 }
 0x1c9   :  { %353 = vsyncpa [#allocation3], 1 }
 0x1ca   :  { %354 = vsyncpa [#allocation6], 1 }
 0x1cb   :  { %355 = vsyncpa [#allocation9], 1 }
 0x1cc   :  { %356 = vsyncpa [#allocation4], 1 }

</bundles_post_ra>
